<compile_context>
chip_gen: v7x
topology: tpu7x:2x2x1
jax: 0.10.0
libtpu: 0.0.40
codegen_flags: <defaults>
</compile_context>

<pallas_src>
import functools

import jax
import jax.numpy as jnp
from jax.experimental import pallas as pl
from jax.experimental.pallas import tpu as pltpu


# ----------------------------- generation config -----------------------------

@functools.lru_cache(maxsize=None)
def _cfg():
    """Generation-aware tile targets / VMEM limit (v5e / v6e / v7x)."""
    kind = ""
    try:
        kind = jax.devices()[0].device_kind.lower()
    except Exception:
        pass
    if "v7" in kind or "7x" in kind:
        # 64 MiB physical VMEM -> conservative scoped limit; 256-wide MXU tiles.
        return dict(tq=256, tr=256, tr_emb=512, vmem=48 * 1024 * 1024, gelu_bf16=True)
    if "v6" in kind:
        # 2x256x256 MXU, 128 MiB VMEM -> big tiles, bf16 elementwise is native.
        return dict(tq=256, tr=512, tr_emb=512, vmem=64 * 1024 * 1024, gelu_bf16=True)
    if "v5" in kind:
        # 4x128x128 MXU (128 tiles already saturate it), no bf16 VPU/EUP.
        return dict(tq=128, tr=256, tr_emb=512, vmem=64 * 1024 * 1024, gelu_bf16=False)
    return dict(tq=128, tr=256, tr_emb=256, vmem=32 * 1024 * 1024, gelu_bf16=False)


def _tile(n, target):
    """Largest divisor of n that is <= target and a multiple of 8, else n."""
    if n <= target:
        return n
    for t in range(target, 7, -8):
        if n % t == 0:
            return t
    return n


def _cparams(dim_sem):
    return pltpu.CompilerParams(
        dimension_semantics=dim_sem,
        vmem_limit_bytes=_cfg()["vmem"],
    )


def _const_spec(shape):
    """Whole-array block with a constant index map (resident weights/biases)."""
    return pl.BlockSpec(shape, lambda *args: (0,) * len(shape))


# ------------------------- fused embedding + LayerNorm -----------------------

def _embed_ln_kernel(w_ref, t_ref, p_ref, g_ref, b_ref, o_ref, *, eps):
    x = (w_ref[...].astype(jnp.float32)
         + t_ref[...].astype(jnp.float32)
         + p_ref[...].astype(jnp.float32))
    mu = jnp.mean(x, axis=-1, keepdims=True)
    var = jnp.mean(jnp.square(x - mu), axis=-1, keepdims=True)
    o_ref[...] = ((x - mu) * jax.lax.rsqrt(var + eps) * g_ref[...] + b_ref[...]
                  ).astype(o_ref.dtype)


def embed_layernorm(w_emb, t_emb, p_emb, gamma, beta, *, eps, tr, seq):
    n, h = w_emb.shape
    s_blocks = seq // tr                       # pos-emb period measured in row tiles
    row = pl.BlockSpec((tr, h), lambda i: (i, 0))
    pos = pl.BlockSpec((tr, h), lambda i: (i % s_blocks, 0))   # reuse, no broadcast
    vec = pl.BlockSpec((1, h), lambda i: (0, 0))
    return pl.pallas_call(
        functools.partial(_embed_ln_kernel, eps=eps),
        out_shape=jax.ShapeDtypeStruct((n, h), jnp.bfloat16),
        grid=(n // tr,),
        in_specs=[row, row, pos, vec, vec],
        out_specs=row,
        compiler_params=_cparams(("parallel",)),
    )(w_emb, t_emb, p_emb, gamma.reshape(1, -1), beta.reshape(1, -1))


# ----------------------------- fused QKV projection --------------------------

def _qkv_kernel(x_ref, w_ref, b_ref, o_ref, *, n_heads, dh):
    # One (tr, H) column chunk (q, k or v) per grid step; written head-major.
    y = jnp.dot(x_ref[...], w_ref[0], preferred_element_type=jnp.float32)
    y = (y + b_ref[0]).astype(o_ref.dtype)
    for h in range(n_heads):
        o_ref[0, h] = y[:, h * dh:(h + 1) * dh]


def qkv_projection(x, w_qkv, b_qkv, *, n_heads, tr):
    # x: (N, H); w_qkv: (3, H, H) with 1/sqrt(dh) folded into Wq; b_qkv: (3, H)
    n, hid = x.shape
    dh = hid // n_heads
    x_spec = pl.BlockSpec((tr, hid), lambda i, c: (i, 0))
    w_spec = pl.BlockSpec((1, hid, hid), lambda i, c: (c, 0, 0))
    b_spec = pl.BlockSpec((1, 1, hid), lambda i, c: (c, 0, 0))
    out_spec = pl.BlockSpec((1, n_heads, tr, dh), lambda i, c: (c, 0, i, 0))
    return pl.pallas_call(
        functools.partial(_qkv_kernel, n_heads=n_heads, dh=dh),
        out_shape=jax.ShapeDtypeStruct((3, n_heads, n, dh), jnp.bfloat16),
        grid=(n // tr, 3),                     # c innermost: x block is not re-fetched
        in_specs=[x_spec, w_spec, b_spec],
        out_specs=out_spec,
        compiler_params=_cparams(("parallel", "parallel")),
    )(x, w_qkv, b_qkv.reshape(3, 1, hid))


# --------------------------- flash-style attention ---------------------------

def _flash_attn_kernel(q_ref, k_ref, v_ref, bias_ref, o_ref, m_sc, l_sc, acc_sc):
    ki = pl.program_id(3)

    @pl.when(ki == 0)
    def _init():
        m_sc[...] = jnp.full_like(m_sc, -jnp.inf)
        l_sc[...] = jnp.zeros_like(l_sc)
        acc_sc[...] = jnp.zeros_like(acc_sc)

    q = q_ref[0, 0, 0]                       # (tq, dh) bf16, 1/sqrt(dh) folded in Wq
    k = k_ref[0, 0, 0]                       # (tk, dh) bf16
    v = v_ref[0, 0, 0]                       # (tk, dh) bf16
    s = jax.lax.dot_general(q, k, (((1,), (1,)), ((), ())),
                            preferred_element_type=jnp.float32)        # (tq, tk)
    s = s + bias_ref[0]                      # (1, tk) additive key mask

    m_prev = m_sc[...]
    m_new = jnp.maximum(m_prev, jnp.max(s, axis=-1, keepdims=True))
    alpha = jnp.exp(m_prev - m_new)
    p = jnp.exp(s - m_new)
    l_sc[...] = alpha * l_sc[...] + jnp.sum(p, axis=-1, keepdims=True)
    acc_sc[...] = alpha * acc_sc[...] + jnp.dot(p.astype(v.dtype), v,
                                                preferred_element_type=jnp.float32)
    m_sc[...] = m_new

    @pl.when(ki == pl.num_programs(3) - 1)
    def _finalize():
        # Exact divide: runs once per (head, batch, q-tile); approx recip not worth it.
        o_ref[0, 0] = (acc_sc[...] / l_sc[...]).astype(o_ref.dtype)


def flash_attention(qkv, bias, *, tq, tk):
    # qkv: (3, nH, B, S, dh) bf16 (q/k/v stacked, head-major); bias: (B, 1, S) f32.
    _, n_heads, b, s, dh = qkv.shape
    q_spec = pl.BlockSpec((1, 1, 1, tq, dh), lambda h, bi, qi, ki: (0, h, bi, qi, 0))
    k_spec = pl.BlockSpec((1, 1, 1, tk, dh), lambda h, bi, qi, ki: (1, h, bi, ki, 0))
    v_spec = pl.BlockSpec((1, 1, 1, tk, dh), lambda h, bi, qi, ki: (2, h, bi, ki, 0))
    bias_spec = pl.BlockSpec((1, 1, tk), lambda h, bi, qi, ki: (bi, 0, ki))
    out_spec = pl.BlockSpec((1, 1, tq, dh), lambda h, bi, qi, ki: (h, bi, qi, 0))
    return pl.pallas_call(
        _flash_attn_kernel,
        out_shape=jax.ShapeDtypeStruct((n_heads, b, s, dh), jnp.bfloat16),
        grid=(n_heads, b, s // tq, s // tk),
        in_specs=[q_spec, k_spec, v_spec, bias_spec],
        out_specs=out_spec,
        scratch_shapes=[pltpu.VMEM((tq, 1), jnp.float32),     # running max
                        pltpu.VMEM((tq, 1), jnp.float32),     # running sum
                        pltpu.VMEM((tq, dh), jnp.float32)],   # per-head output acc
        compiler_params=_cparams(("parallel", "parallel", "parallel", "arbitrary")),
    )(qkv, qkv, qkv, bias)


# ----------------- fused out-projection + residual + LayerNorm ---------------

def _proj_add_ln_kernel(a_ref, w_ref, b_ref, res_ref, g_ref, be_ref, o_ref,
                        *, eps, n_heads):
    # a_ref: (nH, tr, dh) head-major; w_ref: (nH, dh, H) -> y = sum_h a_h @ Wo_h
    y = res_ref[...].astype(jnp.float32) + b_ref[...]
    for h in range(n_heads):                  # leading-axis views only (no lane slices)
        y = y + jnp.dot(a_ref[h], w_ref[h], preferred_element_type=jnp.float32)
    mu = jnp.mean(y, axis=-1, keepdims=True)
    var = jnp.mean(jnp.square(y - mu), axis=-1, keepdims=True)
    o_ref[...] = ((y - mu) * jax.lax.rsqrt(var + eps) * g_ref[...] + be_ref[...]
                  ).astype(o_ref.dtype)


def attn_out_residual_ln(a, w, b, residual, gamma, beta, *, eps, tr):
    # a: (nH, N, dh); w: (nH, dh, H); residual: (N, H)
    n_heads, n, dh = a.shape
    hid = residual.shape[1]
    a_spec = pl.BlockSpec((n_heads, tr, dh), lambda i: (0, i, 0))
    row = pl.BlockSpec((tr, hid), lambda i: (i, 0))
    vec = pl.BlockSpec((1, hid), lambda i: (0, 0))
    return pl.pallas_call(
        functools.partial(_proj_add_ln_kernel, eps=eps, n_heads=n_heads),
        out_shape=jax.ShapeDtypeStruct((n, hid), jnp.bfloat16),
        grid=(n // tr,),
        in_specs=[a_spec, _const_spec(w.shape), vec, row, vec, vec],
        out_specs=row,
        compiler_params=_cparams(("parallel",)),
    )(a, w, b.reshape(1, -1), residual, gamma.reshape(1, -1), beta.reshape(1, -1))


# ------------------------- fused FFN + residual + LayerNorm ------------------

def _ffn_add_ln_kernel(x_ref, w1_ref, b1_ref, w2_ref, b2_ref, g_ref, be_ref,
                       o_ref, *, eps, gelu_bf16):
    x = x_ref[...]
    h1 = jnp.dot(x, w1_ref[...], preferred_element_type=jnp.float32) + b1_ref[...]
    # TODO(synk): HF BERT default is exact erf GELU; tanh approximation kept here.
    if gelu_bf16:      # v6e/v7x: bf16 VPU/EUP -> halve transcendental/VALU work
        h1 = jax.nn.gelu(h1.astype(jnp.bfloat16), approximate=True)
    else:              # v5e: no bf16 VPU/EUP, keep f32
        h1 = jax.nn.gelu(h1, approximate=True)
    y = jnp.dot(h1.astype(x.dtype), w2_ref[...], preferred_element_type=jnp.float32)
    y = y + b2_ref[...] + x.astype(jnp.float32)
    mu = jnp.mean(y, axis=-1, keepdims=True)
    var = jnp.mean(jnp.square(y - mu), axis=-1, keepdims=True)
    o_ref[...] = ((y - mu) * jax.lax.rsqrt(var + eps) * g_ref[...] + be_ref[...]
                  ).astype(o_ref.dtype)


def ffn_residual_ln(x, w1, b1, w2, b2, gamma, beta, *, eps, tr, gelu_bf16):
    n, hid = x.shape
    inter = w1.shape[1]
    row = pl.BlockSpec((tr, hid), lambda i: (i, 0))
    vec = pl.BlockSpec((1, hid), lambda i: (0, 0))
    b1_spec = pl.BlockSpec((1, inter), lambda i: (0, 0))
    return pl.pallas_call(
        functools.partial(_ffn_add_ln_kernel, eps=eps, gelu_bf16=gelu_bf16),
        out_shape=jax.ShapeDtypeStruct((n, hid), jnp.bfloat16),
        grid=(n // tr,),
        in_specs=[row, _const_spec(w1.shape), b1_spec, _const_spec(w2.shape),
                  vec, vec, vec],
        out_specs=row,
        compiler_params=_cparams(("parallel",)),
    )(x, w1, b1.reshape(1, -1), w2, b2.reshape(1, -1),
      gamma.reshape(1, -1), beta.reshape(1, -1))


# --------------- fused head: mean-pool -> embedder -> classifier -------------

def _head_kernel(x_ref, g1_ref, b1_ref, we_ref, be_ref,
                 g2_ref, b2_ref, wc_ref, bc_ref, emb_ref, logit_ref, *, eps):
    # pooled_output = torch.mean(last_hidden_state, 1)  (includes padded tokens)
    pooled = jnp.mean(x_ref[...].astype(jnp.float32), axis=1)        # (tb, H)

    # embedder: LayerNorm -> Linear -> Tanh -> Dropout(identity in eval)
    mu = jnp.mean(pooled, axis=-1, keepdims=True)
    var = jnp.mean(jnp.square(pooled - mu), axis=-1, keepdims=True)
    e = (pooled - mu) * jax.lax.rsqrt(var + eps) * g1_ref[...] + b1_ref[...]
    emb = jnp.tanh(jnp.dot(e, we_ref[...], preferred_element_type=jnp.float32)
                   + be_ref[...])
    # TODO(synk): nn.Dropout omitted (identity in eval mode).
    emb_ref[...] = emb

    # classifier: LayerNorm -> Linear -> Tanh -> Dropout(identity) -> Softmax
    mu2 = jnp.mean(emb, axis=-1, keepdims=True)
    var2 = jnp.mean(jnp.square(emb - mu2), axis=-1, keepdims=True)
    c = (emb - mu2) * jax.lax.rsqrt(var2 + eps) * g2_ref[...] + b2_ref[...]
    z = jnp.tanh(jnp.dot(c, wc_ref[...], preferred_element_type=jnp.float32)
                 + bc_ref[...])
    z = z - jnp.max(z, axis=-1, keepdims=True)
    ez = jnp.exp(z)
    logit_ref[...] = ez / jnp.sum(ez, axis=-1, keepdims=True)


def fused_head(last_hidden, g1, b1, we, be, g2, b2, wc, bc):
    bsz, seq, hid = last_hidden.shape
    emb_dim = we.shape[1]
    out_dim = wc.shape[1]
    tb = _tile(bsz, 8)                          # batch-tiled (v7x VMEM / megacore)
    args = (last_hidden, g1.reshape(1, -1), b1.reshape(1, -1), we,
            be.reshape(1, -1), g2.reshape(1, -1), b2.reshape(1, -1),
            wc, bc.reshape(1, -1))
    x_spec = pl.BlockSpec((tb, seq, hid), lambda i: (i, 0, 0))
    in_specs = [x_spec] + [_const_spec(a.shape) for a in args[1:]]
    return pl.pallas_call(
        functools.partial(_head_kernel, eps=1e-5),   # torch nn.LayerNorm default eps
        out_shape=(jax.ShapeDtypeStruct((bsz, emb_dim), jnp.float32),
                   jax.ShapeDtypeStruct((bsz, out_dim), jnp.float32)),
        grid=(bsz // tb,),
        in_specs=in_specs,
        out_specs=(pl.BlockSpec((tb, emb_dim), lambda i: (i, 0)),
                   pl.BlockSpec((tb, out_dim), lambda i: (i, 0))),
        compiler_params=_cparams(("parallel",)),
    )(*args)


# --------------------------- parameter construction --------------------------

def init_params(key, cfg):
    H, I, E, O, nH = cfg["H"], cfg["I"], cfg["E"], cfg["O"], cfg["nH"]
    dh = H // nH
    scale = 1.0 / (dh ** 0.5)

    def nxt():
        nonlocal key
        key, sub = jax.random.split(key)
        return sub

    def dense(din, dout):
        w = 0.02 * jax.random.normal(nxt(), (din, dout), jnp.float32)
        return w, jnp.zeros((dout,), jnp.float32)

    def ln(d):
        return jnp.ones((d,), jnp.float32), jnp.zeros((d,), jnp.float32)

    p = {
        "word_emb": 0.02 * jax.random.normal(nxt(), (cfg["vocab"], H), jnp.float32),
        "pos_emb": 0.02 * jax.random.normal(nxt(), (cfg["max_pos"], H), jnp.float32),
        "type_emb": 0.02 * jax.random.normal(nxt(), (cfg["type_vocab"], H), jnp.float32),
        "emb_ln": ln(H),
        "layers": [],
        "emb_head_ln": ln(H),
        "emb_head": dense(H, E),     # head weights kept f32 (tiny, precision)
        "cls_ln": ln(E),
        "cls": dense(E, O),
    }
    for _ in range(cfg["layers"]):
        wq, bq = dense(H, H)
        wk, bk = dense(H, H)
        wv, bv = dense(H, H)
        wo, bo = dense(H, H)
        w1, b1 = dense(H, I)
        w2, b2 = dense(I, H)
        p["layers"].append({
            # stacked QKV weight (3, H, H); attention scale 1/sqrt(dh) folded in Wq/bq
            "wqkv": jnp.stack([wq * scale, wk, wv], axis=0).astype(jnp.bfloat16),
            "bqkv": jnp.stack([bq * scale, bk, bv], axis=0),
            "wo": wo.astype(jnp.bfloat16), "bo": bo, "ln1": ln(H),
            "w1": w1.astype(jnp.bfloat16), "b1": b1,
            "w2": w2.astype(jnp.bfloat16), "b2": b2, "ln2": ln(H),
        })
    return p


# --------------------------------- forward -----------------------------------

def kobert_forward(params, token_ids, attention_mask, token_type_ids, cfg):
    B, S = token_ids.shape
    H, nH = cfg["H"], cfg["nH"]
    dh = H // nH
    N = B * S
    g = _cfg()

    tr = _tile(N, g["tr"])           # row tile for projection / FFN kernels
    tr_emb = _tile(S, g["tr_emb"])   # embedding row tile (divides S -> pos-emb reuse)
    tq = _tile(S, g["tq"])
    tk = _tile(S, g["tq"])

    # Embedding gathers are plain-JAX glue; sum + LayerNorm fused in one kernel.
    # pos_emb stays (S, H) (no (B*S, H) broadcast) and the gathered inputs are
    # bf16 (f32 accumulation inside the kernel).
    pos = jnp.arange(S)
    w_e = params["word_emb"][token_ids].reshape(N, H).astype(jnp.bfloat16)
    t_e = params["type_emb"][token_type_ids.astype(jnp.int32)].reshape(N, H).astype(
        jnp.bfloat16)
    p_e = params["pos_emb"][pos].astype(jnp.bfloat16)
    x = embed_layernorm(w_e, t_e, p_e, *params["emb_ln"],
                        eps=1e-12, tr=tr_emb, seq=S)                  # (N, H) bf16

    # BERT-style additive attention-mask bias, kept un-duplicated as (B, 1, S)
    bias = ((1.0 - attention_mask.astype(jnp.float32)) * -10000.0)[:, None, :]

    for lp in params["layers"]:
        qkv = qkv_projection(x, lp["wqkv"], lp["bqkv"], n_heads=nH, tr=tr)  # (3,nH,N,dh)
        a = flash_attention(qkv.reshape(3, nH, B, S, dh), bias,
                            tq=tq, tk=tk)                                   # (nH,B,S,dh)
        x = attn_out_residual_ln(a.reshape(nH, N, dh),
                                 lp["wo"].reshape(nH, dh, H), lp["bo"],
                                 x, *lp["ln1"], eps=1e-12, tr=tr)
        x = ffn_residual_ln(x, lp["w1"], lp["b1"], lp["w2"], lp["b2"],
                            *lp["ln2"], eps=1e-12, tr=tr, gelu_bf16=g["gelu_bf16"])

    last_hidden_state = x.reshape(B, S, H)

    # fused head: mean-pool + embedder + classifier in a single batch-tiled kernel
    embeddings, logits = fused_head(
        last_hidden_state,
        *params["emb_head_ln"], *params["emb_head"],
        *params["cls_ln"], *params["cls"])
    return embeddings, logits


# ----------------------------------- main ------------------------------------

if __name__ == "__main__":
    cfg = dict(vocab=100, max_pos=16, type_vocab=2,
               H=32, nH=4, layers=2, I=64, E=16, O=4)
    B, S = 2, 8

    params = init_params(jax.random.PRNGKey(0), cfg)

    k1, _ = jax.random.split(jax.random.PRNGKey(0))
    token_ids = jax.random.randint(k1, (B, S), 0, cfg["vocab"], dtype=jnp.int32)
    token_type_ids = jnp.zeros((B, S), dtype=jnp.int32)
    attention_mask = jnp.ones((B, S), dtype=jnp.float32).at[1, 6:].set(0.0)  # pad tail

    embeddings, logits = kobert_forward(params, token_ids, attention_mask,
                                        token_type_ids, cfg)
    jax.block_until_ready((embeddings, logits))

    assert embeddings.shape == (B, cfg["E"]) and logits.shape == (B, cfg["O"])
    assert bool(jnp.all(jnp.isfinite(embeddings))) and bool(jnp.all(jnp.isfinite(logits)))
    assert jnp.allclose(jnp.sum(logits, axis=-1), 1.0, atol=1e-5)  # softmax rows sum to 1
    print("KERNEL_OK")
</pallas_src>

<mosaic_0001>
module attributes {stable_mosaic.version = 11 : i64} {
  func.func @_embed_ln_kernel(%arg0: i32, %arg1: memref<8x32xbf16, #tpu.memory_space<vmem>>, %arg2: memref<8x32xbf16, #tpu.memory_space<vmem>>, %arg3: memref<8x32xbf16, #tpu.memory_space<vmem>>, %arg4: memref<1x32xf32, #tpu.memory_space<vmem>>, %arg5: memref<1x32xf32, #tpu.memory_space<vmem>>, %arg6: memref<8x32xbf16, #tpu.memory_space<vmem>>) attributes {dimension_semantics = [#tpu.dimension_semantics<parallel>], iteration_bounds = array<i64: 2>, scalar_prefetch = 0 : i64, scratch_operands = 0 : i64, tpu.core_type = #tpu.core_type<tc>, window_params = [{transform_indices = @transform_0, window_bounds = array<i64: 8, 32>}, {transform_indices = @transform_1, window_bounds = array<i64: 8, 32>}, {transform_indices = @transform_2, window_bounds = array<i64: 8, 32>}, {pipeline_mode = #tpu.pipeline_mode<synchronous>, transform_indices = @transform_3, window_bounds = array<i64: 1, 32>}, {pipeline_mode = #tpu.pipeline_mode<synchronous>, transform_indices = @transform_4, window_bounds = array<i64: 1, 32>}, {transform_indices = @transform_5, window_bounds = array<i64: 8, 32>}]} {
    %c0 = arith.constant 0 : index
    %c0_0 = arith.constant 0 : index
    %0 = vector.load %arg1[%c0, %c0_0] : memref<8x32xbf16, #tpu.memory_space<vmem>>, vector<8x32xbf16>
    %1 = arith.extf %0 : vector<8x32xbf16> to vector<8x32xf32>
    %c0_1 = arith.constant 0 : index
    %c0_2 = arith.constant 0 : index
    %2 = vector.load %arg2[%c0_1, %c0_2] : memref<8x32xbf16, #tpu.memory_space<vmem>>, vector<8x32xbf16>
    %3 = arith.extf %2 : vector<8x32xbf16> to vector<8x32xf32>
    %4 = arith.addf %1, %3 : vector<8x32xf32>
    %c0_3 = arith.constant 0 : index
    %c0_4 = arith.constant 0 : index
    %5 = vector.load %arg3[%c0_3, %c0_4] : memref<8x32xbf16, #tpu.memory_space<vmem>>, vector<8x32xbf16>
    %6 = arith.extf %5 : vector<8x32xbf16> to vector<8x32xf32>
    %7 = arith.addf %4, %6 : vector<8x32xf32>
    %cst = arith.constant dense<0.000000e+00> : vector<8xf32>
    %8 = vector.multi_reduction <add>, %7, %cst [1] : vector<8x32xf32> to vector<8xf32>
    %9 = vector.shape_cast %8 : vector<8xf32> to vector<8x1xf32>
    %cst_5 = arith.constant 3.200000e+01 : f32
    %10 = vector.broadcast %cst_5 : f32 to vector<8x1xf32>
    %11 = arith.divf %9, %10 : vector<8x1xf32>
    %12 = vector.broadcast %11 : vector<8x1xf32> to vector<8x32xf32>
    %13 = arith.subf %7, %12 : vector<8x32xf32>
    %14 = arith.mulf %13, %13 : vector<8x32xf32>
    %cst_6 = arith.constant dense<0.000000e+00> : vector<8xf32>
    %15 = vector.multi_reduction <add>, %14, %cst_6 [1] : vector<8x32xf32> to vector<8xf32>
    %16 = vector.shape_cast %15 : vector<8xf32> to vector<8x1xf32>
    %cst_7 = arith.constant 3.200000e+01 : f32
    %17 = vector.broadcast %cst_7 : f32 to vector<8x1xf32>
    %18 = arith.divf %16, %17 : vector<8x1xf32>
    %19 = vector.broadcast %11 : vector<8x1xf32> to vector<8x32xf32>
    %20 = arith.subf %7, %19 : vector<8x32xf32>
    %cst_8 = arith.constant 9.99999996E-13 : f32
    %21 = vector.broadcast %cst_8 : f32 to vector<8x1xf32>
    %22 = arith.addf %18, %21 : vector<8x1xf32>
    %23 = math.rsqrt %22 : vector<8x1xf32>
    %24 = vector.broadcast %23 : vector<8x1xf32> to vector<8x32xf32>
    %25 = arith.mulf %20, %24 : vector<8x32xf32>
    %c0_9 = arith.constant 0 : index
    %c0_10 = arith.constant 0 : index
    %26 = vector.load %arg4[%c0_9, %c0_10] : memref<1x32xf32, #tpu.memory_space<vmem>>, vector<1x32xf32>
    %27 = vector.broadcast %26 : vector<1x32xf32> to vector<8x32xf32>
    %28 = arith.mulf %25, %27 : vector<8x32xf32>
    %c0_11 = arith.constant 0 : index
    %c0_12 = arith.constant 0 : index
    %29 = vector.load %arg5[%c0_11, %c0_12] : memref<1x32xf32, #tpu.memory_space<vmem>>, vector<1x32xf32>
    %30 = vector.broadcast %29 : vector<1x32xf32> to vector<8x32xf32>
    %31 = arith.addf %28, %30 : vector<8x32xf32>
    %32 = arith.truncf %31 : vector<8x32xf32> to vector<8x32xbf16>
    %c0_13 = arith.constant 0 : index
    %c0_14 = arith.constant 0 : index
    %33 = vector.load %arg6[%c0_13, %c0_14] : memref<8x32xbf16, #tpu.memory_space<vmem>>, vector<8x32xbf16>
    tpu.vector_store %arg6[%c0_13, %c0_14], %32 {strides = array<i32>} : memref<8x32xbf16, #tpu.memory_space<vmem>>, vector<8x32xbf16>,
    return
  }
  func.func @transform_0(%arg0: i32) -> (i32, i32) {
    %c0_i32 = arith.constant 0 : i32
    %c0_i32_0 = arith.constant 0 : i32
    return %arg0, %c0_i32 : i32, i32
  }
  func.func @transform_1(%arg0: i32) -> (i32, i32) {
    %c0_i32 = arith.constant 0 : i32
    %c0_i32_0 = arith.constant 0 : i32
    return %arg0, %c0_i32 : i32, i32
  }
  func.func @transform_2(%arg0: i32) -> (i32, i32) {
    %c1_i32 = arith.constant 1 : i32
    %c0_i32 = arith.constant 0 : i32
    %0 = arith.cmpi eq, %c1_i32, %c0_i32 : i32
    %c1_i32_0 = arith.constant 1 : i32
    %1 = arith.select %0, %c1_i32_0, %c1_i32 : i32
    %2 = arith.remsi %arg0, %1 : i32
    %c0_i32_1 = arith.constant 0 : i32
    %3 = arith.cmpi ne, %2, %c0_i32_1 : i32
    %c0_i32_2 = arith.constant 0 : i32
    %4 = arith.cmpi slt, %2, %c0_i32_2 : i32
    %c0_i32_3 = arith.constant 0 : i32
    %5 = arith.cmpi slt, %1, %c0_i32_3 : i32
    %6 = arith.xori %4, %5 : i1
    %7 = arith.andi %6, %3 : i1
    %8 = arith.addi %2, %1 : i32
    %9 = arith.select %7, %8, %2 : i32
    %c0_i32_4 = arith.constant 0 : i32
    %c0_i32_5 = arith.constant 0 : i32
    return %9, %c0_i32_4 : i32, i32
  }
  func.func @transform_3(%arg0: i32) -> (i32, i32) {
    %c0_i32 = arith.constant 0 : i32
    %c0_i32_0 = arith.constant 0 : i32
    %c0_i32_1 = arith.constant 0 : i32
    return %c0_i32, %c0_i32_0 : i32, i32
  }
  func.func @transform_4(%arg0: i32) -> (i32, i32) {
    %c0_i32 = arith.constant 0 : i32
    %c0_i32_0 = arith.constant 0 : i32
    %c0_i32_1 = arith.constant 0 : i32
    return %c0_i32, %c0_i32_0 : i32, i32
  }
  func.func @transform_5(%arg0: i32) -> (i32, i32) {
    %c0_i32 = arith.constant 0 : i32
    %c0_i32_0 = arith.constant 0 : i32
    return %arg0, %c0_i32 : i32, i32
  }
}

</mosaic_0001>

<bundles_post_ra>
// kernel: tpu_custom_call.1
= control target key start
LH: loop header
LB: loop body
LE: loop exit
PB: predicated region body
PF: predicated region fallthrough
CT: control target
= control target key end

     0   :  { %10 = vsyncpa [#allocation3], 0  ;;  %s884_s0 = inlined_call_operand.hbm [shape: bf16[16,32], index: 0, kind: input, shape index: {}]   ;;  %s885_s1 = inlined_call_operand.hbm [shape: bf16[16,32], index: 1, kind: input, shape index: {}]   ;;  %s886_s2 = inlined_call_operand.vmem [shape: bf16[8,32], index: 2, kind: input, shape index: {}]   ;;  %s887_s3 = inlined_call_operand.vmem [shape: f32[1,32], index: 3, kind: input, shape index: {}]   ;;  %s888_s4 = inlined_call_operand.vmem [shape: f32[1,32], index: 4, kind: input, shape index: {}]   ;;  %s889_s5 = inlined_call_operand.hbm [shape: bf16[16,32], index: 5, kind: output, shape index: {}]  }
   0x1   :  { %12 = vsyncpa [#allocation3 + $0x1], 0 }
   0x2   :  { %13 = vsyncpa [#allocation6], 0 }
   0x3   :  { %15 = vsyncpa [#allocation6 + $0x1], 0 }
   0x4   :  { %16 = vsyncpa [#allocation4], 0 }
   0x5   :  { %18 = vsyncpa [#allocation4 + $0x1], 0  ;;  %s661_s18 = smov 0   ;;  %s663_s19 = smov 0  }
   0x6   :  { %s665_s20 = smov 0   ;;  %s667_s21 = smov 0  }
   0x7 LB: > { %s682_s22 = sadd.s32 4294967295, %s626_s21   ;;  %s426_s23 = sadd.s32 4294967294, %s626_s21   ;;  %s626_s21 = sphi %s667_s21, %s908_s21   ;;  %s622_s20 = sphi %s665_s20, %s907_s20   ;;  %s618_s19 = sphi %s663_s19, %s906_s19   ;;  %s614_s18 = sphi %s661_s18, %s905_s18  }
   0x8   : > { %s686_s24 = sadd.s32 1, %s626_s21   ;;  %s31_s25 = sadd.s32 1, %s622_s20 }
   0x9   : > { %s28_s26 = ssub.s32 %s626_s21, %s686_s24  ;;  %p38_p0 = scmp.ne.s32.totalorder %s622_s20, %s618_s19 }
   0xa   : > { %p29_p1 = scmp.eq.s32.totalorder %s28_s26, 0  ;;  %p39_p2 = scmp.eq.s32.totalorder %s626_s21, 0 }
   0xb   : > { %p44_p3 = scmp.ne.s32.totalorder %s618_s19, %s614_s18  ;;  %p45_p4 = scmp.eq.s32.totalorder %s682_s22, 0 }
   0xc   : > { %s698_s27 = scalar_select %p29_p1, %s622_s20, %s31_s25  }
   0xd   : > { %p700_p5 = por %p39_p2, %p38_p0  ;;  %p704_p6 = por %p45_p4, %p44_p3 }
   0xe   : > { %p157_p7 = scmp.eq.s32.totalorder %s682_s22, 1  ;;  %p163_p8 = scmp.eq.s32.totalorder %s426_s23, 1 }
   0xf   : > { %s893_s29 = scalar_select %p704_p6, 1, 0 }
  0x10   : > { %p460_p10 = scmp.lt.s32.totalorder %s626_s21, 2  ;;  %p711_p11 = por %p157_p7, %p38_p0 }
  0x11   : > { %p715_p12 = por %p163_p8, %p44_p3  ;;  %s720_s7 = sand.u32 1, %s622_s20  }
  0x12   : > { %s894_s30 = scalar_select %p711_p11, 1, 0 }
  0x13   : > { %s895_s6 = scalar_select %p715_p12, 1, 0 }
  0x14   : > { %s430_s8 = sshll.u32 %s626_s21, 6  ;;  %s429_s9 = sshll.u32 %s720_s7, 2 }
  0x15   : > { %s729_s12 = scalar_lea.hbm %s884_s0, %s430_s8  ;;  %s196_s13 = scalar_lea.vmem [#allocation2], %s429_s9 }
  0x16   : > { %s203_s14 = sshll.u32 %s196_s13, 4  ;;  %p735_p13 = pnand %p460_p10, %p700_p5  ;;  %s739_s14 = int_to_ptr.vmem [resolvable:$true] %s203_s14 }
  0x17   : > { %s193_s16 = scalar_lea.sflag [#allocation3], %s720_s7  ;;  %s496_s17 = scalar_lea.hbm %s729_s12, 64 }
  0x18   : > { %p497_p2 = scmp.ne.s32.totalorder %s729_s12, %s496_s17  ;;  %p498_p3 = pneg %p735_p13 }
  0x19   : > { %s501_s26 = scalar_lea.hbm %s884_s0, 128  ;;  %p502_p5 = scmp.lt.u32.totalorder %s729_s12, %s884_s0 }
  0x1a   : > { %p499_p4 = pnand %p498_p3, %p497_p2  ;;  %p503_p8 = scmp.lt.u32.totalorder %s501_s26, %s496_s17 }
  0x1b   : > { %p505_p9 = scmp.lt.u32.totalorder %s496_s17, %s729_s12 }
  0x1c   : > { %p500_p7 = pneg %p499_p4  ;;  %p504_p10 = por %p503_p8, %p502_p5 }
  0x1e   : > { %p506_p0 = por %p505_p9, %p504_p10 }
  0x20   : > { %p507_p1 = pnand %p506_p0, %p500_p7 }
  0x22   : > { %510 = shalt.err (!%p507_p1)
}
  0x23   : > { %s511_s11 = scalar_lea.vmem %s739_s14, 64  ;;  %s628_s13 = smov [#allocation2]  }
  0x24   : > { %p512_p2 = scmp.ne.s32.totalorder %s739_s14, %s511_s11  ;;  %s516_s23 = sshll.u32 %s628_s13, 4  ;;  %s517_s23 = int_to_ptr.vmem [resolvable:$false] %s516_s23 }
  0x25   : > { %s518_s25 = scalar_lea.vmem %s517_s23, 128  ;;  %p519_p11 = scmp.lt.s32.totalorder %s739_s14, %s517_s23 }
  0x26   : > { %p514_p4 = pnand %p512_p2, %p498_p3  ;;  %p520_p5 = scmp.lt.s32.totalorder %s518_s25, %s511_s11 }
  0x28   : > { %p515_p12 = pneg %p514_p4  ;;  %p521_p8 = por %p520_p5, %p519_p11 }
  0x2a   : > { %p522_p9 = pnand %p521_p8, %p515_p12 }
  0x2c   : > { %525 = shalt.err (!%p522_p9)
}
  0x2d   : > { %452 = dma.hbm_to_vmem [thread:$0]  (!%p735_p13), %s729_s12, 64, %s739_s14, %s193_s16  }
  0x2e   : > { %p897_p0 = scmp.lt.s32.totalorder %s626_s21, 3  ;;  %p898_p1 = scmp.ge.s32.totalorder %s626_s21, 1 }
  0x2f   : > { %s782_s10 = scalar_lea.hbm %s885_s1, %s430_s8  ;;  %s214_s11 = scalar_lea.vmem [#allocation5], %s429_s9 }
  0x30   : > { %p773_p7 = pnand %p898_p1, %p897_p0  ;;  %s221_s13 = sshll.u32 %s214_s11, 4  ;;  %s222_s13 = int_to_ptr.vmem [resolvable:$true] %s221_s13 }
  0x31   : > { %s211_s12 = scalar_lea.sflag [#allocation6], %s720_s7  ;;  %s526_s14 = scalar_lea.hbm %s782_s10, 64 }
  0x32   : > { %s899_s17 = scalar_select %p773_p7, 1, 0 }
  0x33   : > { %p527_p11 = scmp.ne.s32.totalorder %s782_s10, %s526_s14  ;;  %s531_s8 = scalar_lea.hbm %s885_s1, 128 }
  0x34   : > { %p532_p2 = scmp.lt.u32.totalorder %s782_s10, %s885_s1  ;;  %p533_p4 = scmp.lt.u32.totalorder %s531_s8, %s526_s14 }
  0x35   : > { %p529_p12 = pnand %p527_p11, %p498_p3  ;;  %p535_p8 = scmp.lt.u32.totalorder %s526_s14, %s782_s10 }
  0x36   : > { %p534_p5 = por %p533_p4, %p532_p2 }
  0x37   : > { %p530_p10 = pneg %p529_p12 }
  0x38   : > { %p536_p9 = por %p535_p8, %p534_p5 }
  0x3a   : > { %p537_p0 = pnand %p536_p9, %p530_p10 }
  0x3c   : > { %540 = shalt.err (!%p537_p0)
}
  0x3d   : > { %s541_s7 = scalar_lea.vmem %s222_s13, 64  ;;  %s629_s9 = smov [#allocation5]  }
  0x3e   : > { %p542_p1 = scmp.ne.s32.totalorder %s222_s13, %s541_s7  ;;  %s546_s28 = sshll.u32 %s629_s9, 4  ;;  %s547_s28 = int_to_ptr.vmem [resolvable:$false] %s546_s28 }
  0x3f   : > { %s548_s11 = scalar_lea.vmem %s547_s28, 128  ;;  %p549_p6 = scmp.lt.s32.totalorder %s222_s13, %s547_s28 }
  0x40   : > { %p544_p11 = pnand %p542_p1, %p498_p3  ;;  %p550_p7 = scmp.lt.s32.totalorder %s548_s11, %s541_s7 }
  0x42   : > { %p545_p12 = pneg %p544_p11  ;;  %p551_p2 = por %p550_p7, %p549_p6 }
  0x44   : > { %p552_p4 = pnand %p551_p2, %p545_p12 }
  0x46   : > { %555 = shalt.err (!%p552_p4)
}
  0x47   : > { %455 = dma.hbm_to_vmem [thread:$0]  (!%p735_p13), %s782_s10, 64, %s222_s13, %s211_s12  }
  0x48   : > { %p900_p10 = scmp.ne.s32.totalorder %s899_s17, 0 }
  0x49   : > { %s809_s14 = sand.u32 (!%p900_p10), 1, %s618_s19   ;;  %p901_p6 = scmp.ne.s32.totalorder (!%p900_p10), %s893_s29, 0 }
  0x4a   : > { %230 = sbr.rel (%p900_p10) target bundleno = 420 (0x1a4), region = 40  ;;  %s812_s16 = sshll.u32 (!%p900_p10), %s809_s14, 2 }
  0x4b   : > { %s233_s23 = scalar_lea.sflag (!%p900_p10), [#allocation3], %s809_s14  ;;  %s236_s8 = scalar_lea.vmem (!%p900_p10), [#allocation2], %s812_s16 }
  0x51   : > { %601 = dma.done.wait (%p901_p6), %s233_s23, 64  }
  0x52   : > { %603 = vsyncadd (%p901_p6), %s233_s23, 4294967232  ;;  %s242_s15 = scalar_lea.sflag [#allocation6], %s809_s14  ;;  %s245_s17 = scalar_lea.vmem [#allocation5], %s812_s16 }
  0x53   : > { %605 = dma.done.wait (%p901_p6), %s242_s15, 64  }
  0x54   : > { %607 = vsyncadd (%p901_p6), %s242_s15, 4294967232  ;;  %v277_v0 = vld [vmem:[%s236_s8] sm:$0xf]  ;;  %v279_v1 = vld [vmem:[%s245_s17] sm:$0xf]  ;;  %vm285_vm0 = vcmask 261120  }
  0x55   : > { %v282_v2 = vld [vmem:[%s886_s2] sm:$0xf]  ;;  %v278_v3 = vunpack.c.l.bf16 %v277_v0  ;;  %v280_v4 = vunpack.c.l.bf16 %v279_v1  ;;  %s440_s7 = sshll.u32 %s682_s22, 6  ;;  %s276_s9 = scalar_lea.vmem [#allocation7], %s812_s16  ;;  %vm317_vm1 = vcmask 257024  }
  0x56   : > { %v283_v5 = vunpack.c.l.bf16 %v282_v2  ;;  %v437_v18 = vld [vmem:[%s887_s3] ss:$0 sm:$0xff]  ;;  %s333_s28 = sshll.u32 %s276_s9, 4  ;;  %s840_s8 = scalar_lea.hbm %s889_s5, %s440_s7  ;;  %s842_s28 = int_to_ptr.vmem [resolvable:$true] %s333_s28 }
  0x57   : > { %v281_v6 = vadd.f32 %v280_v4, %v278_v3  ;;  %v438_v20 = vld [vmem:[%s888_s4] ss:$0 sm:$0xff]  ;;  %s320_s15 = scalar_lea.sflag [#allocation4], %s809_s14  ;;  %s556_s17 = scalar_lea.vmem %s842_s28, 64 }
  0x58   : > { %p557_p13 = scmp.ne.s32.totalorder %s842_s28, %s556_s17  ;;  %p902_p3 = scmp.ne.s32.totalorder %s894_s30, 0 }
  0x59   : > { %v284_v7 = vadd.f32 %v283_v5, %v281_v6  ;;  %s630_s22 = smov [#allocation7]  }
  0x5a   : > { %p558_p7 = pnand %p557_p13, %p902_p3  ;;  %s560_s16 = sshll.u32 %s630_s22, 4  ;;  %s561_s16 = int_to_ptr.vmem [resolvable:$false] %s560_s16 }
  0x5b   : > { %v286_v8 = vsel %vm285_vm0, %v284_v7, 0.0  ;;  %s562_s10 = scalar_lea.vmem %s561_s16, 128  ;;  %p563_p8 = scmp.lt.s32.totalorder %s842_s28, %s561_s16 }
  0x5c   : > { %287 = vadd.xlane.f32.xlu0 %v286_v8  ;;  %p559_p5 = pneg %p558_p7  ;;  %p564_p9 = scmp.lt.s32.totalorder %s562_s10, %s556_s17 }
  0x5e   : > { %p565_p0 = por %p564_p9, %p563_p8 }
  0x60   : > { %p566_p1 = pnand %p565_p0, %p559_p5 }
  0xe9   : > { %v288_v9 = vpop.xlane.xlu0 %287 }
  0xea   : > { %v290_v10 = vmul.f32 0.03125, %v288_v9 }
  0xec   : > { %v291_v11 = vsub.f32 %v284_v7, %v290_v10 }
  0xee   : > { %v292_v12 = vmul.f32 %v291_v11, %v291_v11 }
  0xf0   : > { %v293_v13 = vsel %vm285_vm0, %v292_v12, 0.0 }
  0xf1   : > { %294 = vadd.xlane.f32.xlu0 %v293_v13 }
 0x17e   : > { %v295_v14 = vpop.xlane.xlu0 %294 }
 0x17f   : > { %v296_v15 = vmul.f32 0.03125, %v295_v14 }
 0x181   : > { %v297_v16 = vadd.f32 1e-12, %v296_v15 }
 0x183   : > { %494 = vrsqrt.f32 %v297_v16 }
 0x18d   : > { %v495_v17 = vpop.eup %494 }
 0x18e   : > { %v299_v19 = vmul.f32 %v495_v17, %v291_v11 }
 0x190   : > { %v307_v21 = vmul.f32 %v437_v18, %v299_v19 }
 0x192   : > { %v315_v22 = vadd.f32 %v438_v20, %v307_v21 }
 0x194   : > { %v316_v23 = vpack.c.bf16 %v315_v22, %v315_v22 }
 0x196   : > { %318 = vst.msk [vmem:[%s276_s9] sm:$0xf] %vm317_vm1, %v316_v23 }
 0x197   : > { %569 = shalt.err (!%p566_p1)
}
 0x198   : > { %s570_s14 = scalar_lea.hbm %s840_s8, 64  ;;  %s574_s12 = scalar_lea.hbm %s889_s5, 128 }
 0x199   : > { %p571_p11 = scmp.ne.s32.totalorder %s840_s8, %s570_s14  ;;  %p575_p4 = scmp.lt.u32.totalorder %s840_s8, %s889_s5 }
 0x19a   : > { %p576_p10 = scmp.lt.u32.totalorder %s574_s12, %s570_s14  ;;  %p578_p13 = scmp.lt.u32.totalorder %s570_s14, %s840_s8 }
 0x19b   : > { %p572_p12 = pnand %p571_p11, %p902_p3 }
 0x19c   : > { %p577_p6 = por %p576_p10, %p575_p4 }
 0x19d   : > { %p573_p2 = pneg %p572_p12 }
 0x19e   : > { %p579_p7 = por %p578_p13, %p577_p6 }
 0x1a0   : > { %p580_p5 = pnand %p579_p7, %p573_p2 }
 0x1a2   : > { %583 = shalt.err (!%p580_p5)
}
 0x1a3   : > { %447 = dma.vmem_to_hbm [thread:$0]  (%p902_p3), %s842_s28, 64, %s840_s8, %s320_s15  }
 0x1a4 PF: > { %s345_s7 = sand.u32 1, %s614_s18   ;;  %p903_p8 = scmp.ne.s32.totalorder %s895_s6, 0 }
 0x1a5   : > { %p904_p9 = scmp.ge.s32.totalorder %s626_s21, 2  ;;  %s346_s9 = scalar_lea.sflag [#allocation4], %s345_s7 }
 0x1a7   : > { %p457_p0 = pnand %p904_p9, %p903_p8 }
 0x1a9   : > { %609 = dma.done.wait (!%p457_p0), %s346_s9, 64  }
 0x1aa   : > { %611 = vsyncadd (!%p457_p0), %s346_s9, 4294967232  ;;  %p21_p1 = scmp.ge.s32.totalorder %s686_s24, 4   ;;  %s905_s18 = smov %s618_s19 }
 0x1ab   : > { %s906_s19 = smov %s622_s20  ;;  %s907_s20 = smov %s698_s27 }
 0x1ac   : > { %s908_s21 = smov %s686_s24  ;;  %23 = sbr.rel (!%p21_p1) target bundleno = 7 (0x7), region = 98 }
 0x1b3   :  { %351 = vsyncpa [#allocation3], 1 }
 0x1b4   :  { %353 = vsyncpa [#allocation3 + $0x1], 1 }
 0x1b5   :  { %354 = vsyncpa [#allocation6], 1 }
 0x1b6   :  { %356 = vsyncpa [#allocation6 + $0x1], 1 }
 0x1b7   :  { %357 = vsyncpa [#allocation4], 1 }
 0x1b8   :  { %359 = vsyncpa [#allocation4 + $0x1], 1 }

</bundles_post_ra>
